<compile_context>
chip_gen: v7x
topology: tpu7x:2x2x1
jax: 0.10.0
libtpu: 0.0.40
codegen_flags: <defaults>
</compile_context>

<pallas_src>
import functools

import jax
import jax.numpy as jnp
from jax.experimental import pallas as pl
from jax.experimental.pallas import tpu as pltpu


def _round_up(v: int, m: int) -> int:
    return ((v + m - 1) // m) * m


def _lane_tile(dim: int, cap: int) -> int:
    """Tile for a lane-major (last-dim) axis: multiple of 128, snapped to a
    multiple of 256 when big enough (full v6e/v7x MXU tile)."""
    t = min(cap, _round_up(dim, 128))
    if t >= 256:
        t = (t // 256) * 256
    return t


def _choose_tiles(batch, inputt, hidden, *, tm_cap=512, tn_cap=512, tk_cap=1024):
    tn = _lane_tile(hidden, tn_cap)
    tk = _lane_tile(inputt, tk_cap)
    tm = min(tm_cap, _round_up(batch, 8))
    # v7x megacore: guarantee >= 2 tiles on a parallel axis when the batch is
    # splittable, otherwise one TensorCore idles on grid=(1,1,k).
    n_m = _round_up(batch, tm) // tm
    n_n = _round_up(hidden, tn) // tn
    if n_m < 2 and n_n < 2 and _round_up(batch, 8) >= 16:
        tm = _round_up((_round_up(batch, 8) + 1) // 2, 8)
    return tm, tn, tk


def prepare_decoder_params(weight, bias, *, compute_dtype=jnp.bfloat16,
                           tn_cap=512, tk_cap=1024):
    """One-time parameter setup (hoisted out of the per-call path).

    weight: [hidden, inputt]  (torch nn.Linear.weight layout)
    bias:   [hidden]
    Returns (w_t_padded [Ip, Hp] in compute_dtype, bias_padded [1, Hp] f32).
    """
    hidden, inputt = weight.shape
    tn = _lane_tile(hidden, tn_cap)
    tk = _lane_tile(inputt, tk_cap)
    Hp = _round_up(hidden, tn)
    Ip = _round_up(inputt, tk)
    w_t = jnp.pad(jnp.asarray(weight).T, ((0, Ip - inputt), (0, Hp - hidden)))
    b_p = jnp.pad(jnp.asarray(bias, jnp.float32), (0, Hp - hidden)).reshape(1, Hp)
    return w_t.astype(compute_dtype), b_p


def _decoder_kernel_single_k(x_ref, w_ref, b_ref, o_ref):
    """Whole K fits in one tile: no accumulator scratch, direct epilogue."""
    o_ref[...] = jnp.maximum(
        jnp.dot(x_ref[...], w_ref[...], preferred_element_type=jnp.float32)
        + b_ref[...],
        0.0,
    ).astype(o_ref.dtype)


def _decoder_kernel_multi_k(x_ref, w_ref, b_ref, o_ref, acc_ref):
    """K reduction over program_id(2) (>= 2 steps).

    First step writes the partial product (no zero-init); last step fuses the
    final partial product + bias + ReLU into the output store (no extra acc
    round trip)."""
    k = pl.program_id(2)
    nk = pl.num_programs(2)
    p = jnp.dot(x_ref[...], w_ref[...], preferred_element_type=jnp.float32)

    @pl.when(k == 0)
    def _():
        acc_ref[...] = p

    @pl.when(jnp.logical_and(k > 0, k < nk - 1))
    def _():
        acc_ref[...] += p

    @pl.when(k == nk - 1)
    def _():
        o_ref[...] = jnp.maximum(acc_ref[...] + p + b_ref[...], 0.0).astype(o_ref.dtype)


@functools.partial(
    jax.jit,
    static_argnames=("inputt", "hidden", "tm_cap", "tn_cap", "tk_cap"),
)
def decoder_forward(x, w_t_padded, b_padded, *, inputt, hidden,
                    tm_cap=512, tn_cap=512, tk_cap=1024):
    """relu(x @ W^T + b) with pre-padded / pre-cast params.

    x:          [B, inputt]  f32 (cast to the weight's compute dtype per call)
    w_t_padded: [Ip, Hp]     (from prepare_decoder_params)
    b_padded:   [1, Hp]      f32
    """
    B, I = x.shape
    assert I == inputt
    Ip, Hp = w_t_padded.shape
    tm, tn, tk = _choose_tiles(B, inputt, hidden,
                               tm_cap=tm_cap, tn_cap=tn_cap, tk_cap=tk_cap)
    assert Hp % tn == 0 and Ip % tk == 0, "params prepared with different tile caps"

    Bp = _round_up(B, tm)
    # Only the activation is touched per call: pad + cast to the MXU dtype.
    x_p = jnp.pad(x.astype(w_t_padded.dtype), ((0, Bp - B), (0, Ip - I)))

    n_m, n_n, n_k = Bp // tm, Hp // tn, Ip // tk
    grid = (n_m, n_n, n_k)

    itemsize = jnp.dtype(w_t_padded.dtype).itemsize
    cost = pl.CostEstimate(
        flops=2 * Bp * Ip * Hp,
        transcendentals=0,
        bytes_accessed=(Bp * Ip * itemsize * n_n      # x re-streamed per N tile
                        + Ip * Hp * itemsize * n_m    # W re-streamed per M tile
                        + Hp * 4 * n_m                # bias
                        + Bp * Hp * 4),               # output
    )

    # TODO(synk): if a profile shows exposed DMA on the weight stream (tiny
    # per-tile compute), add pipeline_mode=pl.Buffered(3) to the W BlockSpec.
    in_specs = [
        pl.BlockSpec((tm, tk), lambda i, j, k: (i, k)),   # x tile
        pl.BlockSpec((tk, tn), lambda i, j, k: (k, j)),   # W^T tile
        pl.BlockSpec((1, tn), lambda i, j, k: (0, j)),    # bias tile
    ]
    out_spec = pl.BlockSpec((tm, tn), lambda i, j, k: (i, j))

    if n_k == 1:
        kernel = _decoder_kernel_single_k
        scratch = []
    else:
        kernel = _decoder_kernel_multi_k
        scratch = [pltpu.VMEM((tm, tn), jnp.float32)]

    out_p = pl.pallas_call(
        kernel,
        out_shape=jax.ShapeDtypeStruct((Bp, Hp), jnp.float32),
        grid_spec=pl.GridSpec(
            grid=grid,
            in_specs=in_specs,
            out_specs=out_spec,
            scratch_shapes=scratch,
        ),
        compiler_params=pltpu.CompilerParams(
            dimension_semantics=("parallel", "parallel", "arbitrary"),
            vmem_limit_bytes=32 * 1024 * 1024,
        ),
        cost_estimate=cost,
    )(x_p, w_t_padded, b_padded)

    return out_p[:B, :hidden]


if __name__ == "__main__":
    key = jax.random.PRNGKey(0)

    def run_case(batch, inputt, hidden, case_key):
        kx, kw, kb = jax.random.split(case_key, 3)
        # Deterministic synthetic params (mimic nn.Linear's uniform init range).
        bound = 1.0 / jnp.sqrt(jnp.float32(inputt))
        W = jax.random.uniform(kw, (hidden, inputt), jnp.float32, -bound, bound)
        b = jax.random.uniform(kb, (hidden,), jnp.float32, -bound, bound)
        x = jax.random.normal(kx, (batch, inputt), jnp.float32)

        w_t_p, b_p = prepare_decoder_params(W, b)            # one-time setup
        out = decoder_forward(x, w_t_p, b_p, inputt=inputt, hidden=hidden)
        out = jax.block_until_ready(out)

        # Reference with matched bf16 MXU inputs (f32 accumulate / bias / relu).
        x16 = x.astype(jnp.bfloat16).astype(jnp.float32)
        w16 = W.astype(jnp.bfloat16).astype(jnp.float32)
        ref = jnp.maximum(x16 @ w16.T + b, 0.0)
        assert out.shape == (batch, hidden)
        assert jnp.allclose(out, ref, atol=1e-2, rtol=1e-2), float(
            jnp.max(jnp.abs(out - ref)))
        return out

    k1, k2 = jax.random.split(key)
    # Shapes implied by the module: Decoder(inputt=32, hidden=64), batch=8
    # (exercises the single-K, scratch-less kernel path).
    run_case(8, 32, 64, k1)
    # Slightly larger case exercising the multi-K accumulator + M-split path.
    run_case(16, 384, 256, k2)

    print("KERNEL_OK")
</pallas_src>

<mosaic_0001>
module attributes {stable_mosaic.version = 11 : i64} {
  func.func @_decoder_kernel_single_k(%arg0: i32, %arg1: i32, %arg2: i32, %arg3: memref<8x128xbf16, #tpu.memory_space<vmem>>, %arg4: memref<128x128xbf16, #tpu.memory_space<vmem>>, %arg5: memref<1x128xf32, #tpu.memory_space<vmem>>, %arg6: memref<8x128xf32, #tpu.memory_space<vmem>>) attributes {dimension_semantics = [#tpu.dimension_semantics<parallel>, #tpu.dimension_semantics<parallel>, #tpu.dimension_semantics<arbitrary>], iteration_bounds = array<i64: 1, 1, 1>, scalar_prefetch = 0 : i64, scratch_operands = 0 : i64, tpu.core_type = #tpu.core_type<tc>, window_params = [{transform_indices = @transform_0, window_bounds = array<i64: 8, 128>}, {transform_indices = @transform_1, window_bounds = array<i64: 128, 128>}, {transform_indices = @transform_2, window_bounds = array<i64: 1, 128>}, {transform_indices = @transform_3, window_bounds = array<i64: 8, 128>}]} {
    %c0 = arith.constant 0 : index
    %c0_0 = arith.constant 0 : index
    %0 = vector.load %arg3[%c0, %c0_0] : memref<8x128xbf16, #tpu.memory_space<vmem>>, vector<8x128xbf16>
    %c0_1 = arith.constant 0 : index
    %c0_2 = arith.constant 0 : index
    %1 = vector.load %arg4[%c0_1, %c0_2] : memref<128x128xbf16, #tpu.memory_space<vmem>>, vector<128x128xbf16>
    %cst = arith.constant dense<0.000000e+00> : vector<8x128xf32>
    %2 = tpu.matmul %0, %1, %cst {dimension_numbers = #tpu.dot_dimension_numbers<[1], [0], [0], [1], [0, 0, 1, 1], [], []>} : vector<8x128xbf16>, vector<128x128xbf16>, vector<8x128xf32> -> vector<8x128xf32>
    %c0_3 = arith.constant 0 : index
    %c0_4 = arith.constant 0 : index
    %3 = vector.load %arg5[%c0_3, %c0_4] : memref<1x128xf32, #tpu.memory_space<vmem>>, vector<1x128xf32>
    %4 = vector.broadcast %3 : vector<1x128xf32> to vector<8x128xf32>
    %5 = arith.addf %2, %4 : vector<8x128xf32>
    %cst_5 = arith.constant 0.000000e+00 : f32
    %6 = vector.broadcast %cst_5 : f32 to vector<8x128xf32>
    %7 = arith.maximumf %5, %6 : vector<8x128xf32>
    %c0_6 = arith.constant 0 : index
    %c0_7 = arith.constant 0 : index
    %8 = vector.load %arg6[%c0_6, %c0_7] : memref<8x128xf32, #tpu.memory_space<vmem>>, vector<8x128xf32>
    tpu.vector_store %arg6[%c0_6, %c0_7], %7 {strides = array<i32>} : memref<8x128xf32, #tpu.memory_space<vmem>>, vector<8x128xf32>,
    return
  }
  func.func @transform_0(%arg0: i32, %arg1: i32, %arg2: i32) -> (i32, i32) {
    %c0_i32 = arith.constant 0 : i32
    return %arg0, %arg2 : i32, i32
  }
  func.func @transform_1(%arg0: i32, %arg1: i32, %arg2: i32) -> (i32, i32) {
    %c0_i32 = arith.constant 0 : i32
    return %arg2, %arg1 : i32, i32
  }
  func.func @transform_2(%arg0: i32, %arg1: i32, %arg2: i32) -> (i32, i32) {
    %c0_i32 = arith.constant 0 : i32
    %c0_i32_0 = arith.constant 0 : i32
    return %c0_i32, %arg1 : i32, i32
  }
  func.func @transform_3(%arg0: i32, %arg1: i32, %arg2: i32) -> (i32, i32) {
    %c0_i32 = arith.constant 0 : i32
    return %arg0, %arg1 : i32, i32
  }
}

</mosaic_0001>

<bundles_post_ra>
// kernel: decoder_forward.1
= control target key start
LH: loop header
LB: loop body
LE: loop exit
PB: predicated region body
PF: predicated region fallthrough
CT: control target
= control target key end

     0   :  { %8 = vsyncpa [#allocation3], 0  ;;  %s315_s0 = inlined_call_operand.vmem [shape: bf16[8,128], index: 0, kind: input, shape index: {}]   ;;  %s316_s1 = inlined_call_operand.hbm [shape: bf16[128,128], index: 1, kind: input, shape index: {}]   ;;  %s317_s2 = inlined_call_operand.vmem [shape: f32[1,128], index: 2, kind: input, shape index: {}]   ;;  %s318_s3 = inlined_call_operand.hbm [shape: f32[8,128], index: 3, kind: output, shape index: {}]  }
   0x1   :  { %9 = vsyncpa [#allocation4], 0  ;;  %s259_s12 = smov [#allocation2]   ;;  %s211_s16 = scalar_lea.hbm %s316_s1, 1024 }
   0x2   :  { %s17_s13 = sshll.u32 %s259_s12, 4  ;;  %p212_p0 = scmp.ne.s32.totalorder %s316_s1, %s211_s16  ;;  %s18_s13 = int_to_ptr.vmem [resolvable:$true] %s17_s13 }
   0x3   :  { %p215_p1 = scmp.lt.u32.totalorder %s211_s16, %s316_s1 }
   0x5   :  { %p217_p2 = pnand %p215_p1, %p212_p0 }
   0x7   :  { %220 = shalt.err (!%p217_p2)
}
   0x8   :  { %s221_s21 = scalar_lea.vmem %s18_s13, 1024  ;;  %p226_p4 = scmp.lt.s32.totalorder %s18_s13, %s18_s13 }
   0x9   :  { %p222_p3 = scmp.ne.s32.totalorder %s18_s13, %s221_s21  ;;  %p227_p5 = scmp.lt.s32.totalorder %s221_s21, %s221_s21 }
   0xb   :  { %p228_p6 = por %p227_p5, %p226_p4 }
   0xd   :  { %p229_p7 = pnand %p228_p6, %p222_p3 }
   0xf   :  { %232 = shalt.err (!%p229_p7)
}
  0x10   :  { %s260_s22 = smov 64   ;;  %s261_s23 = smov 4  }
  0x11   :  { %23 = dma.hbm_to_vmem [thread:$0]  %s316_s1, 1024, %s18_s13, [#allocation3], %s260_s22, %s260_s22, %s261_s23  }
  0x12   :  { %255 = dma.done.wait [#allocation3], 1024  }
  0x13   :  { %256 = vsyncadd [#allocation3], 4294966272  ;;  %v262_v0 = vmov 0.0   ;;  %vm263_vm0 = vmmov 0   ;;  %v203_v1 = vld [vmem:[#allocation2] sm:$0xff]   ;;  %v204_v2 = vld [vmem:[#allocation2 + $0x8] sm:$0xff]  }
  0x14   :  { %177 = vmatprep.subr.bf16.mxu0 %v262_v0  ;;  %193 = vmatprep.mubr.msk.bf16.mxu0 %vm263_vm0, %v262_v0  ;;  %v205_v3 = vld [vmem:[#allocation2 + $0x10] sm:$0xff]   ;;  %v206_v4 = vld [vmem:[#allocation2 + $0x18] sm:$0xff]   ;;  %v207_v5 = vld [vmem:[#allocation2 + $0x20] sm:$0xff]   ;;  %s264_s29 = smov [#allocation5]  }
  0x15   :  { %178 = vmatpush3.bf16.msra.mxu0 %v203_v1  ;;  %v208_v6 = vld [vmem:[#allocation2 + $0x28] sm:$0xff]   ;;  %v209_v7 = vld [vmem:[#allocation2 + $0x30] sm:$0xff]   ;;  %v210_v8 = vld [vmem:[#allocation2 + $0x38] sm:$0xff]   ;;  %s150_s30 = sshll.u32 %s264_s29, 4  ;;  %s151_s30 = int_to_ptr.vmem [resolvable:$true] %s150_s30 }
  0x16   :  { %179 = vmatprep.subr.bf16.mxu0 %v262_v0  ;;  %v30_v9 = vld [vmem:[%s315_s0] sm:$0xf]  ;;  %s233_s4 = scalar_lea.vmem %s151_s30, 128  ;;  %p238_p9 = scmp.lt.s32.totalorder %s151_s30, %s151_s30 }
  0x17   :  { %v159_v10 = vld [vmem:[%s317_s2] ss:$0 sm:$0xff]  ;;  %p234_p8 = scmp.ne.s32.totalorder %s151_s30, %s233_s4  ;;  %p239_p10 = scmp.lt.s32.totalorder %s233_s4, %s233_s4 }
  0x19   :  { %180 = vmatpush3.bf16.msra.mxu0 %v204_v2  ;;  %p240_p11 = por %p239_p10, %p238_p9 }
  0x1a   :  { %181 = vmatprep.subr.bf16.mxu0 %v262_v0 }
  0x1b   :  { %p241_p12 = pnand %p240_p11, %p234_p8 }
  0x1d   :  { %182 = vmatpush3.bf16.msra.mxu0 %v205_v3 }
  0x1e   :  { %183 = vmatprep.subr.bf16.mxu0 %v262_v0 }
  0x21   :  { %184 = vmatpush3.bf16.msra.mxu0 %v206_v4 }
  0x22   :  { %185 = vmatprep.subr.bf16.mxu0 %v262_v0 }
  0x25   :  { %186 = vmatpush3.bf16.msra.mxu0 %v207_v5 }
  0x26   :  { %187 = vmatprep.subr.bf16.mxu0 %v262_v0 }
  0x29   :  { %188 = vmatpush3.bf16.msra.mxu0 %v208_v6 }
  0x2a   :  { %189 = vmatprep.subr.bf16.mxu0 %v262_v0 }
  0x2d   :  { %190 = vmatpush3.bf16.msra.mxu0 %v209_v7 }
  0x2e   :  { %191 = vmatprep.subr.bf16.mxu0 %v262_v0 }
  0x31   :  { %192 = vmatpush3.bf16.msra.mxu0 %v210_v8 }
  0x34   :  { %194 = vmatmul.mubr.bf16.vlgmr.msra.gmra.mrb[0].mxu0 %v30_v9 }
 0x107   :  { %v136_v11 = vpop.f32.mrb[0].mxu0 }
 0x108   :  { %v137_v12 = vadd.f32 %v159_v10, %v136_v11  ;;  %v195_v13 = vpop.f32.mrb[1].mxu0 }
 0x109   :  { %v139_v14 = vpop.f32.mrb[2].mxu0 }
 0x10a   :  { %v142_v15 = vmax.f32 %v137_v12, 0.0  ;;  %v196_v16 = vpop.f32.mrb[3].mxu0 }
 0x10c   :  { %143 = vst [vmem:[#allocation5] sm:$0xff] %v142_v15 }
 0x10d   :  { %244 = shalt.err (!%p241_p12)
}
 0x10e   :  { %s245_s2 = scalar_lea.hbm %s318_s3, 128 }
 0x10f   :  { %p246_p13 = scmp.ne.s32.totalorder %s318_s3, %s245_s2  ;;  %p249_p0 = scmp.lt.u32.totalorder %s245_s2, %s318_s3 }
 0x111   :  { %p251_p1 = pnand %p249_p0, %p246_p13 }
 0x113   :  { %254 = shalt.err (!%p251_p1)
}
 0x114   :  { %153 = dma.vmem_to_hbm [thread:$0]  %s151_s30, 128, %s318_s3, [#allocation4]  }
 0x115   :  { %257 = dma.done.wait [#allocation4], 128  }
 0x116   :  { %258 = vsyncadd [#allocation4], 4294967168 }
 0x117   :  { %157 = vsyncpa [#allocation3], 1 }
 0x118   :  { %158 = vsyncpa [#allocation4], 1 }

</bundles_post_ra>
